<compile_context>
chip_gen: v5e
topology: v5e:2x2
jax: 0.10.0
libtpu: 0.0.40
codegen_flags: <defaults>
</compile_context>

<pallas_src>
import functools

import jax
import jax.numpy as jnp
from jax.experimental import pallas as pl
from jax.experimental.pallas import tpu as pltpu


def _round_up(n, m):
    return ((n + m - 1) // m) * m


def _localization_kernel(x_ref, w_ref, b_ref, y_ref):
    """Fused linear: y = x @ W_cat + b_cat, packed output.

    x_ref: [tile_m, D]
    w_ref: [D, 3S]   columns = [act_0..act_{S-1}, az_0, el_0, az_1, el_1, ...]
    b_ref: [1, 3S]
    y_ref: [tile_m, 3S]
    """
    y = jnp.dot(x_ref[...], w_ref[...], preferred_element_type=jnp.float32)
    y_ref[...] = (y + b_ref[...]).astype(y_ref.dtype)


def _resident_spec(shape):
    """Constant-index (VMEM-resident) operand; single-buffered when supported."""
    index_map = lambda i, _n=len(shape): (0,) * _n
    try:
        return pl.BlockSpec(shape, index_map, pipeline_mode=pl.Buffered(1))
    except TypeError:  # older jax without pipeline_mode on BlockSpec
        return pl.BlockSpec(shape, index_map)


def _choose_tile_m(M, D, itemsize):
    """Row-tile heuristic: ~2 MiB of x per block, VMEM-safe on v5e/v6e/v7x."""
    align = max(8, 32 // max(itemsize, 1))      # sublane packing: f32->8, bf16->16
    row_bytes = max(D * itemsize, 1)
    target_bytes = 2 << 20                      # ~2 MiB x per block (mem-bound sweet spot)
    vmem_budget = 24 << 20                      # hard cap: double-buffered x well under
    tile = max((target_bytes // row_bytes) // align * align, align)
    tile = min(tile, max((vmem_budget // (2 * row_bytes)) // align * align, align))
    if M > align:                               # >=2 grid steps -> both v7x TCs get work
        tile = min(tile, _round_up(-(-M // 2), align))
    tile = min(tile, _round_up(M, align))
    return max(tile, align)


def prepare_params(params):
    """One-time (cold-path) fusion of the three torch-layout Linear layers.

    Returns W_cat [D, 3S] and b_cat [1, 3S] with azimuth/elevation columns
    interleaved so the kernel's packed output reshapes directly to (..., S, 2).
    """
    wa = params["w_act"]          # [S, D]
    wz = params["w_azi"]          # [S, D]
    we = params["w_ele"]          # [S, D]
    S, D = wa.shape
    w_doa = jnp.stack((wz, we), axis=1).reshape(2 * S, D)   # az0, el0, az1, el1, ...
    w_cat = jnp.concatenate((wa, w_doa), axis=0).T          # [D, 3S]
    b_doa = jnp.stack((params["b_azi"], params["b_ele"]), axis=1).reshape(2 * S)
    b_cat = jnp.concatenate((params["b_act"], b_doa)).reshape(1, 3 * S)
    return {"w_cat": w_cat, "b_cat": b_cat}


@functools.partial(jax.jit, static_argnames=("tile_m",))
def localization_output(x, fused, tile_m=None):
    """x: [B, T, D]. fused: output of prepare_params.

    Returns (source_activity [B, T, S], direction_of_arrival [B, T, S, 2]).
    """
    B, T, D = x.shape
    n = fused["w_cat"].shape[1]          # 3 * S
    S = n // 3
    M = B * T

    x_itemsize = jnp.dtype(x.dtype).itemsize
    w_itemsize = jnp.dtype(fused["w_cat"].dtype).itemsize
    if tile_m is None:
        tile_m = _choose_tile_m(M, D, x_itemsize)
    grid_m = pl.cdiv(M, tile_m)          # partial last block OK: rows independent,
                                         # OOB output writes are clipped by Pallas.

    cost = pl.CostEstimate(
        flops=2 * M * D * n,
        transcendentals=0,
        bytes_accessed=x_itemsize * (M * D + M * n) + w_itemsize * (D * n + n),
    )

    x2d = x.reshape(M, D)
    y = pl.pallas_call(
        _localization_kernel,
        out_shape=jax.ShapeDtypeStruct((M, n), x.dtype),
        grid=(grid_m,),
        in_specs=[
            pl.BlockSpec((tile_m, D), lambda i: (i, 0)),   # streamed x rows
            _resident_spec((D, n)),                        # resident fused W
            _resident_spec((1, n)),                        # resident fused b
        ],
        out_specs=pl.BlockSpec((tile_m, n), lambda i: (i, 0)),  # packed lane-dense out
        compiler_params=pltpu.CompilerParams(
            dimension_semantics=("parallel",),             # shards across v7x's 2 TCs
        ),
        cost_estimate=cost,
    )(x2d, fused["w_cat"], fused["b_cat"])

    # Cheap split (touches only M*3S values); interleaved columns -> free reshape.
    source_activity = y[:, :S].reshape(B, T, S)
    direction_of_arrival = y[:, S:].reshape(B, T, S, 2)
    return source_activity, direction_of_arrival


def init_params(key, input_dim, max_num_sources, dtype=jnp.float32):
    """Deterministic init mimicking torch nn.Linear default (U[-1/sqrt(D), 1/sqrt(D)])."""
    bound = 1.0 / (input_dim ** 0.5)
    keys = jax.random.split(key, 6)
    u = lambda k, shape: jax.random.uniform(k, shape, dtype, -bound, bound)
    return {
        "w_act": u(keys[0], (max_num_sources, input_dim)),
        "b_act": u(keys[1], (max_num_sources,)),
        "w_azi": u(keys[2], (max_num_sources, input_dim)),
        "b_azi": u(keys[3], (max_num_sources,)),
        "w_ele": u(keys[4], (max_num_sources, input_dim)),
        "b_ele": u(keys[5], (max_num_sources,)),
    }


def _reference(x, params):
    sa = x @ params["w_act"].T + params["b_act"]
    az = x @ params["w_azi"].T + params["b_azi"]
    el = x @ params["w_ele"].T + params["b_ele"]
    return sa, jnp.stack((az, el), axis=-1)


if __name__ == "__main__":
    D, S = 32, 4  # input_dim, max_num_sources

    key = jax.random.PRNGKey(0)
    k_x, k_p, k_x2 = jax.random.split(key, 3)
    params = init_params(k_p, D, S)
    fused = prepare_params(params)          # one-time cold-path weight fusion

    # Case 1: B*T divisible by the row tile.
    B, T = 2, 8
    x = jax.random.normal(k_x, (B, T, D), dtype=jnp.float32)
    sa, doa = localization_output(x, fused)
    jax.block_until_ready((sa, doa))
    sa_ref, doa_ref = _reference(x, params)
    assert sa.shape == (B, T, S) and doa.shape == (B, T, S, 2)
    assert jnp.allclose(sa, sa_ref, atol=1e-5)
    assert jnp.allclose(doa, doa_ref, atol=1e-5)

    # Case 2: B*T NOT divisible by the row tile (exercises the partial last block,
    # i.e. the no-pad path from the perf review).
    B2, T2 = 3, 5
    x2 = jax.random.normal(k_x2, (B2, T2, D), dtype=jnp.float32)
    sa2, doa2 = localization_output(x2, fused)
    jax.block_until_ready((sa2, doa2))
    sa2_ref, doa2_ref = _reference(x2, params)
    assert sa2.shape == (B2, T2, S) and doa2.shape == (B2, T2, S, 2)
    assert jnp.allclose(sa2, sa2_ref, atol=1e-5)
    assert jnp.allclose(doa2, doa2_ref, atol=1e-5)

    print("KERNEL_OK")
</pallas_src>

<mosaic_0001>
module attributes {stable_mosaic.version = 11 : i64} {
  func.func @_localization_kernel(%arg0: i32, %arg1: memref<8x32xf32, #tpu.memory_space<vmem>>, %arg2: memref<32x12xf32, #tpu.memory_space<vmem>>, %arg3: memref<1x12xf32, #tpu.memory_space<vmem>>, %arg4: memref<8x12xf32, #tpu.memory_space<vmem>>) attributes {dimension_semantics = [#tpu.dimension_semantics<parallel>], iteration_bounds = array<i64: 2>, scalar_prefetch = 0 : i64, scratch_operands = 0 : i64, tpu.core_type = #tpu.core_type<tc>, window_params = [{transform_indices = @transform_0, window_bounds = array<i64: 8, 32>}, {pipeline_mode = #tpu.pipeline_mode<synchronous>, transform_indices = @transform_1, window_bounds = array<i64: 32, 12>}, {pipeline_mode = #tpu.pipeline_mode<synchronous>, transform_indices = @transform_2, window_bounds = array<i64: 1, 12>}, {transform_indices = @transform_3, window_bounds = array<i64: 8, 12>}]} {
    %c0 = arith.constant 0 : index
    %c0_0 = arith.constant 0 : index
    %0 = vector.load %arg1[%c0, %c0_0] : memref<8x32xf32, #tpu.memory_space<vmem>>, vector<8x32xf32>
    %c0_1 = arith.constant 0 : index
    %c0_2 = arith.constant 0 : index
    %1 = vector.load %arg2[%c0_1, %c0_2] : memref<32x12xf32, #tpu.memory_space<vmem>>, vector<32x12xf32>
    %cst = arith.constant dense<0.000000e+00> : vector<8x12xf32>
    %2 = tpu.matmul %0, %1, %cst {dimension_numbers = #tpu.dot_dimension_numbers<[1], [0], [0], [1], [0, 0, 1, 1], [], []>} : vector<8x32xf32>, vector<32x12xf32>, vector<8x12xf32> -> vector<8x12xf32>
    %c0_3 = arith.constant 0 : index
    %c0_4 = arith.constant 0 : index
    %3 = vector.load %arg3[%c0_3, %c0_4] : memref<1x12xf32, #tpu.memory_space<vmem>>, vector<1x12xf32>
    %4 = vector.broadcast %3 : vector<1x12xf32> to vector<8x12xf32>
    %5 = arith.addf %2, %4 : vector<8x12xf32>
    %c0_5 = arith.constant 0 : index
    %c0_6 = arith.constant 0 : index
    %6 = vector.load %arg4[%c0_5, %c0_6] : memref<8x12xf32, #tpu.memory_space<vmem>>, vector<8x12xf32>
    tpu.vector_store %arg4[%c0_5, %c0_6], %5 {strides = array<i32>} : memref<8x12xf32, #tpu.memory_space<vmem>>, vector<8x12xf32>,
    return
  }
  func.func @transform_0(%arg0: i32) -> (i32, i32) {
    %c0_i32 = arith.constant 0 : i32
    %c0_i32_0 = arith.constant 0 : i32
    return %arg0, %c0_i32 : i32, i32
  }
  func.func @transform_1(%arg0: i32) -> (i32, i32) {
    %c0_i32 = arith.constant 0 : i32
    %c0_i32_0 = arith.constant 0 : i32
    %c0_i32_1 = arith.constant 0 : i32
    return %c0_i32, %c0_i32_0 : i32, i32
  }
  func.func @transform_2(%arg0: i32) -> (i32, i32) {
    %c0_i32 = arith.constant 0 : i32
    %c0_i32_0 = arith.constant 0 : i32
    %c0_i32_1 = arith.constant 0 : i32
    return %c0_i32, %c0_i32_0 : i32, i32
  }
  func.func @transform_3(%arg0: i32) -> (i32, i32) {
    %c0_i32 = arith.constant 0 : i32
    %c0_i32_0 = arith.constant 0 : i32
    return %arg0, %c0_i32 : i32, i32
  }
}

</mosaic_0001>

<bundles_post_ra>
// kernel: localization_output.1
= control target key start
LH: loop header
LB: loop body
LE: loop exit
PB: predicated region body
PF: predicated region fallthrough
CT: control target
= control target key end

     0   :  { %s301_s12 = smov 0   ;;  %s333_s0 = inlined_call_operand.vmem [shape: f32[16,32], index: 0, kind: input, shape index: {}]   ;;  %s334_s1 = inlined_call_operand.vmem [shape: f32[32,12], index: 1, kind: input, shape index: {}]   ;;  %s335_s2 = inlined_call_operand.vmem [shape: f32[1,12], index: 2, kind: input, shape index: {}]   ;;  %s336_s3 = inlined_call_operand.vmem [shape: f32[16,12], index: 3, kind: output, shape index: {}]  }
   0x1 LB: > { %s254_s13 = sadd.s32 4294967295, %s279_s12   ;;  %p258_p0 = scmp.ge.s32.totalorder %s279_s12, 1  ;;  %s279_s12 = sphi %s301_s12, %s13_s12  }
   0x2   : > { %p136_p1 = scmp.lt.s32.totalorder %s279_s12, 3 }
   0x4   : > { %p137_p2 = pnand %p258_p0, %p136_p1 }
   0x5   : > { %p158_p3 = scmp.lt.s32.totalorder (!%p137_p2), %s254_s13, 1 }
   0x6   : > { %140 = sbr.rel (%p137_p2) target bundleno = 148 (0x94), region = 32 }
   0xb   : > { %v170_v0 = vld [vmem:[%s334_s1 + $0x18] sm:$0xff]  ;;  %v169_v1 = vld [vmem:[%s334_s1 + $0x10] sm:$0xff]  ;;  %v168_v2 = vld [vmem:[%s334_s1 + $0x8] sm:$0xff]  ;;  %s338_s13 = smov (!%p158_p3, %s254_s13), 1  ;;  %vm175_vm0 = vcmask 261120   ;;  %vm199_vm1 = vcmask 97280  }
   0xc   : > { %191 = vmatpush.msra.mxu0 %v170_v0  ;;  %v167_v3 = vld [vmem:[%s334_s1] sm:$0xff]  ;;  %s259_s22 = sshll.u32 %s338_s13, 3 }
   0xd   : > { %s161_s25 = scalar_lea.vmem %s333_s0, %s259_s22  ;;  %v272_v5 = vld [vmem:[%s335_s2] ss:$0 sm:$0xff]  ;;  %s165_s30 = scalar_lea.vmem %s336_s3, %s259_s22 }
   0xe   : > { %192 = vmatpush.msra.mxu0 %v169_v1  ;;  %v166_v4 = vld [vmem:[%s161_s25] sm:$0xff] }
  0x10   : > { %193 = vmatpush.msra.mxu0 %v168_v2 }
  0x12   : > { %194 = vmatpush.msra.mxu0 %v167_v3 }
  0x13   : > { %261 = vmatmul.msk.f32.vlgmr.msra.gmra.mxu0 %vm175_vm0, %v166_v4 }
  0x90   : > { %v196_v6 = vpop.f32.mrf.mxu0 }
  0x91   : > { %v197_v7 = vadd.f32 %v272_v5, %v196_v6 }
  0x93   : > { %200 = vst.msk [vmem:[%s165_s30] sm:$0xff] %vm199_vm1, %v197_v7 }
  0x94 PF: > { %s13_s12 = sadd.s32 1, %s279_s12  }
  0x95   : > { %p10_p4 = scmp.ge.s32.totalorder %s13_s12, 4  }
  0x97   :  { %12 = sbr.rel (!%p10_p4) target bundleno = 1 (0x1), region = 62 }

</bundles_post_ra>
